<compile_context>
chip_gen: v7x
topology: tpu7x:2x2x1
jax: 0.10.0
libtpu: 0.0.40
codegen_flags: <defaults>
</compile_context>

<pallas_src>
import jax
import jax.numpy as jnp
from jax.experimental import pallas as pl
from jax.experimental.pallas import tpu as pltpu


def _round_up(x, m):
    return ((x + m - 1) // m) * m


def resgcn_kernel(alphas_ref, betas_ref,          # scalar-prefetch (SMEM)
                  a_ref, h0_ref, w_ref, b_ref,    # inputs (VMEM blocks)
                  out_ref,                        # output block (written on last layer)
                  hbuf_ref):                      # (2, N, D) f32 ping-pong carry
    l = pl.program_id(0)
    n_layers = pl.num_programs(0)

    # One-time init of the ping-pong state.
    @pl.when(l == 0)
    def _():
        hbuf_ref[0] = h0_ref[...]                                    # H_0
        hbuf_ref[1] = jnp.zeros(hbuf_ref.shape[1:], hbuf_ref.dtype)  # H_{-1} = 0

    cur = l & 1          # slot holding H_l
    prv = 1 - cur        # slot holding H_{l-1}; reused below for H_{l+1}

    alpha = alphas_ref[l]
    beta = betas_ref[l]

    h_cur = hbuf_ref[cur]          # (N, D) f32
    h_prev = hbuf_ref[prv]         # (N, D) f32
    h0 = h0_ref[...]               # (N, D) f32

    # A_hat @ H_l  (bf16 MXU inputs, f32 accumulation)
    ah = jnp.dot(a_ref[...], h_cur.astype(jnp.bfloat16),
                 preferred_element_type=jnp.float32)
    # Linear: (A_hat @ H_l) @ W^T + b   (W already pre-transposed in wrapper)
    wh = jnp.dot(ah.astype(jnp.bfloat16), w_ref[0],
                 preferred_element_type=jnp.float32) + b_ref[0]

    h_init = (1.0 - beta) * ah + beta * h0
    h_dyn = (1.0 - alpha) * wh + alpha * h_prev
    h_next = jnp.maximum(h_init + h_dyn, 0.0)

    # Single full-tile store per layer: intermediate layers update the
    # ping-pong slot that held H_{l-1}; the last layer writes the output block.
    @pl.when(l < n_layers - 1)
    def _():
        hbuf_ref[prv] = h_next

    @pl.when(l == n_layers - 1)
    def _():
        out_ref[...] = h_next.astype(out_ref.dtype)


def deep_resgcn(A_hat, H_0, Ws, bs, alphas, betas):
    """Pallas forward for DeepResGCN.

    A_hat: (N, N), H_0: (N, D), Ws: (L, D, D) (PyTorch Linear weights),
    bs: (L, D), alphas/betas: (L,).
    """
    N, D = H_0.shape
    L = Ws.shape[0]

    # Lane/sublane-friendly padding.  Zero padding is exact for this
    # recurrence (padded feature columns stay zero; padded node rows never
    # feed real rows because the corresponding A_hat columns are zero) and is
    # sliced off at the end.
    Dp = _round_up(D, 128)
    Np = _round_up(N, 8)

    A_p = jnp.pad(A_hat, ((0, Np - N), (0, Np - N))).astype(jnp.bfloat16)
    H0_p = jnp.pad(H_0, ((0, Np - N), (0, Dp - D))).astype(jnp.float32)
    # PyTorch Linear: y = x @ W.T + b.  Pre-transpose once here (bf16).
    Wt_p = jnp.pad(Ws, ((0, 0), (0, Dp - D), (0, Dp - D))).transpose(0, 2, 1)
    Wt_p = Wt_p.astype(jnp.bfloat16)
    b_p = jnp.pad(bs, ((0, 0), (0, Dp - D))).astype(jnp.float32).reshape(L, 1, Dp)
    alphas = alphas.astype(jnp.float32)
    betas = betas.astype(jnp.float32)

    # Rough VMEM need (double-buffered inputs + output block + carry scratch)
    # so the scoped limit is raised above the 32 MiB default when N/D grow,
    # while staying within v7x's 64 MiB physical VMEM.
    vmem_need = (2 * A_p.size * 2          # A_hat blocks (bf16)
                 + 2 * Np * Dp * 4         # H_0 block
                 + 2 * Dp * Dp * 2         # W block (bf16)
                 + 2 * Dp * 4              # bias block
                 + 2 * Np * Dp * 4         # output block
                 + 2 * Np * Dp * 4)        # ping-pong carry scratch
    vmem_limit = min(max(32 * 1024 * 1024, int(1.25 * vmem_need) + (1 << 20)),
                     64 * 1024 * 1024)

    cost = pl.CostEstimate(
        flops=2 * L * (Np * Np * Dp + Np * Dp * Dp),
        transcendentals=0,
        bytes_accessed=int(A_p.nbytes + H0_p.nbytes + Wt_p.nbytes + b_p.nbytes
                           + Np * Dp * 4),
    )

    out_p = pl.pallas_call(
        resgcn_kernel,
        out_shape=jax.ShapeDtypeStruct((Np, Dp), H_0.dtype),
        grid_spec=pltpu.PrefetchScalarGridSpec(
            num_scalar_prefetch=2,              # alphas, betas -> SMEM
            grid=(L,),
            in_specs=[
                pl.BlockSpec((Np, Np), lambda l, a, b: (0, 0)),        # A_hat
                pl.BlockSpec((Np, Dp), lambda l, a, b: (0, 0)),        # H_0
                pl.BlockSpec((1, Dp, Dp), lambda l, a, b: (l, 0, 0)),  # Ws^T[l]
                pl.BlockSpec((1, 1, Dp), lambda l, a, b: (l, 0, 0)),   # bs[l]
            ],
            out_specs=pl.BlockSpec((Np, Dp), lambda l, a, b: (0, 0)),
            scratch_shapes=[
                pltpu.VMEM((2, Np, Dp), jnp.float32),   # ping-pong H_l / H_{l-1}
            ],
        ),
        compiler_params=pltpu.CompilerParams(
            dimension_semantics=("arbitrary",),
            vmem_limit_bytes=vmem_limit,
        ),
        cost_estimate=cost,
    )(alphas, betas, A_p, H0_p, Wt_p, b_p)

    return out_p[:N, :D]


def ref_forward_f32(A_hat, H_0, Ws, bs, alphas, betas):
    # Pure-JAX f32 reference matching the PyTorch forward.
    H_l = H_0
    H_prev = jnp.zeros_like(H_0)
    for i in range(Ws.shape[0]):
        ah = A_hat @ H_l
        h_init = (1.0 - betas[i]) * ah + betas[i] * H_0
        h_dyn = (1.0 - alphas[i]) * (ah @ Ws[i].T + bs[i]) + alphas[i] * H_prev
        H_next = jax.nn.relu(h_init + h_dyn)
        H_prev = H_l
        H_l = H_next
    return H_l


def ref_forward_mixed(A_hat, H_0, Ws, bs, alphas, betas):
    # Mirrors the kernel numerics: bf16 MXU inputs, f32 accumulation,
    # f32 epilogue and carries.
    A_b = A_hat.astype(jnp.bfloat16)
    H_l = H_0.astype(jnp.float32)
    H_prev = jnp.zeros_like(H_l)
    for i in range(Ws.shape[0]):
        ah = jnp.dot(A_b, H_l.astype(jnp.bfloat16),
                     preferred_element_type=jnp.float32)
        wh = jnp.dot(ah.astype(jnp.bfloat16), Ws[i].T.astype(jnp.bfloat16),
                     preferred_element_type=jnp.float32) + bs[i]
        h_init = (1.0 - betas[i]) * ah + betas[i] * H_0
        h_dyn = (1.0 - alphas[i]) * wh + alphas[i] * H_prev
        H_next = jnp.maximum(h_init + h_dyn, 0.0)
        H_prev = H_l
        H_l = H_next
    return H_l


if __name__ == "__main__":
    N, D, L = 16, 32, 4   # nodes, feature dim, num_layers

    key = jax.random.PRNGKey(0)
    k_a, k_h, k_w, k_b = jax.random.split(key, 4)

    # Symmetric, degree-normalized adjacency (A_hat-like).
    adj = (jax.random.uniform(k_a, (N, N)) > 0.5).astype(jnp.float32)
    adj = jnp.maximum(adj, adj.T) + jnp.eye(N, dtype=jnp.float32)
    deg = jnp.sum(adj, axis=1, keepdims=True)
    d_inv_sqrt = 1.0 / jnp.sqrt(deg)
    A_hat = d_inv_sqrt * adj * d_inv_sqrt.T

    H_0 = jax.random.normal(k_h, (N, D), dtype=jnp.float32)

    # nn.Linear default init: U(-1/sqrt(D), 1/sqrt(D)) for both W and b.
    bound = 1.0 / jnp.sqrt(jnp.float32(D))
    Ws = jax.random.uniform(k_w, (L, D, D), minval=-bound, maxval=bound,
                            dtype=jnp.float32)
    bs = jax.random.uniform(k_b, (L, D), minval=-bound, maxval=bound,
                            dtype=jnp.float32)
    alphas = jnp.full((L,), 0.1, dtype=jnp.float32)   # nn.Parameter(0.1)
    betas = jnp.full((L,), 0.1, dtype=jnp.float32)    # nn.Parameter(0.1)

    out = deep_resgcn(A_hat, H_0, Ws, bs, alphas, betas)
    out = jax.block_until_ready(out)
    assert out.shape == (N, D)

    ref_mixed = ref_forward_mixed(A_hat, H_0, Ws, bs, alphas, betas)
    ref_f32 = ref_forward_f32(A_hat, H_0, Ws, bs, alphas, betas)

    err_mixed = jnp.max(jnp.abs(out - ref_mixed))
    err_f32 = jnp.max(jnp.abs(out - ref_f32))
    assert jnp.allclose(out, ref_mixed, atol=2e-3, rtol=2e-3), \
        f"max abs err vs mixed-precision ref: {err_mixed}"
    assert jnp.allclose(out, ref_f32, atol=1e-1, rtol=1e-1), \
        f"max abs err vs f32 ref: {err_f32}"

    print("KERNEL_OK")
</pallas_src>

<mosaic_0001>
module attributes {stable_mosaic.version = 11 : i64} {
  func.func @resgcn_kernel(%arg0: i32, %arg1: memref<4xf32, #tpu.memory_space<smem>>, %arg2: memref<4xf32, #tpu.memory_space<smem>>, %arg3: memref<16x16xbf16, #tpu.memory_space<vmem>>, %arg4: memref<16x128xf32, #tpu.memory_space<vmem>>, %arg5: memref<1x128x128xbf16, #tpu.memory_space<vmem>>, %arg6: memref<1x1x128xf32, #tpu.memory_space<vmem>>, %arg7: memref<16x128xf32, #tpu.memory_space<vmem>>, %arg8: memref<2x16x128xf32, #tpu.memory_space<vmem>>) attributes {dimension_semantics = [#tpu.dimension_semantics<arbitrary>], iteration_bounds = array<i64: 4>, scalar_prefetch = 2 : i64, scratch_operands = 1 : i64, tpu.core_type = #tpu.core_type<tc>, window_params = [{pipeline_mode = #tpu.pipeline_mode<synchronous>, transform_indices = @transform_0, window_bounds = array<i64: 16, 16>}, {pipeline_mode = #tpu.pipeline_mode<synchronous>, transform_indices = @transform_1, window_bounds = array<i64: 16, 128>}, {transform_indices = @transform_2, window_bounds = array<i64: 1, 128, 128>}, {transform_indices = @transform_3, window_bounds = array<i64: 1, 1, 128>}, {pipeline_mode = #tpu.pipeline_mode<synchronous>, transform_indices = @transform_4, window_bounds = array<i64: 16, 128>}]} {
    %c0_i32 = arith.constant 0 : i32
    %0 = arith.cmpi eq, %arg0, %c0_i32 : i32
    %1 = arith.extui %0 : i1 to i32
    %c0_i32_0 = arith.constant 0 : i32
    %2 = arith.cmpi ne, %1, %c0_i32_0 : i32
    scf.if %2 {
      %c0_22 = arith.constant 0 : index
      %c0_23 = arith.constant 0 : index
      %48 = vector.load %arg4[%c0_22, %c0_23] : memref<16x128xf32, #tpu.memory_space<vmem>>, vector<16x128xf32>
      %c0_24 = arith.constant 0 : index
      %c0_25 = arith.constant 0 : index
      %c0_26 = arith.constant 0 : index
      %49 = vector.load %arg8[%c0_24, %c0_25, %c0_26] : memref<2x16x128xf32, #tpu.memory_space<vmem>>, vector<1x16x128xf32>
      %50 = vector.shape_cast %49 : vector<1x16x128xf32> to vector<16x128xf32>
      %51 = vector.shape_cast %48 : vector<16x128xf32> to vector<1x16x128xf32>
      tpu.vector_store %arg8[%c0_24, %c0_25, %c0_26], %51 {strides = array<i32>} : memref<2x16x128xf32, #tpu.memory_space<vmem>>, vector<1x16x128xf32>,
      %cst_27 = arith.constant 0.000000e+00 : f32
      %52 = vector.broadcast %cst_27 : f32 to vector<16x128xf32>
      %c1 = arith.constant 1 : index
      %c0_28 = arith.constant 0 : index
      %c0_29 = arith.constant 0 : index
      %53 = vector.load %arg8[%c1, %c0_28, %c0_29] : memref<2x16x128xf32, #tpu.memory_space<vmem>>, vector<1x16x128xf32>
      %54 = vector.shape_cast %53 : vector<1x16x128xf32> to vector<16x128xf32>
      %55 = vector.shape_cast %52 : vector<16x128xf32> to vector<1x16x128xf32>
      tpu.vector_store %arg8[%c1, %c0_28, %c0_29], %55 {strides = array<i32>} : memref<2x16x128xf32, #tpu.memory_space<vmem>>, vector<1x16x128xf32>,
    } else {
    }
    %c1_i32 = arith.constant 1 : i32
    %3 = arith.andi %arg0, %c1_i32 : i32
    %c1_i32_1 = arith.constant 1 : i32
    %4 = arith.subi %c1_i32_1, %3 : i32
    %5 = arith.index_cast %arg0 : i32 to index
    %6 = memref.load %arg1[%5] : memref<4xf32, #tpu.memory_space<smem>>
    %7 = arith.index_cast %arg0 : i32 to index
    %8 = memref.load %arg2[%7] : memref<4xf32, #tpu.memory_space<smem>>
    %9 = arith.index_cast %3 : i32 to index
    %c0 = arith.constant 0 : index
    %c0_2 = arith.constant 0 : index
    %10 = vector.load %arg8[%9, %c0, %c0_2] : memref<2x16x128xf32, #tpu.memory_space<vmem>>, vector<1x16x128xf32>
    %11 = vector.shape_cast %10 : vector<1x16x128xf32> to vector<16x128xf32>
    %12 = arith.index_cast %4 : i32 to index
    %c0_3 = arith.constant 0 : index
    %c0_4 = arith.constant 0 : index
    %13 = vector.load %arg8[%12, %c0_3, %c0_4] : memref<2x16x128xf32, #tpu.memory_space<vmem>>, vector<1x16x128xf32>
    %14 = vector.shape_cast %13 : vector<1x16x128xf32> to vector<16x128xf32>
    %c0_5 = arith.constant 0 : index
    %c0_6 = arith.constant 0 : index
    %15 = vector.load %arg4[%c0_5, %c0_6] : memref<16x128xf32, #tpu.memory_space<vmem>>, vector<16x128xf32>
    %c0_7 = arith.constant 0 : index
    %c0_8 = arith.constant 0 : index
    %16 = vector.load %arg3[%c0_7, %c0_8] : memref<16x16xbf16, #tpu.memory_space<vmem>>, vector<16x16xbf16>
    %17 = arith.truncf %11 : vector<16x128xf32> to vector<16x128xbf16>
    %cst = arith.constant dense<0.000000e+00> : vector<16x128xf32>
    %18 = tpu.matmul %16, %17, %cst {dimension_numbers = #tpu.dot_dimension_numbers<[1], [0], [0], [1], [0, 0, 1, 1], [], []>} : vector<16x16xbf16>, vector<16x128xbf16>, vector<16x128xf32> -> vector<16x128xf32>
    %19 = arith.truncf %18 : vector<16x128xf32> to vector<16x128xbf16>
    %c0_9 = arith.constant 0 : index
    %c0_10 = arith.constant 0 : index
    %c0_11 = arith.constant 0 : index
    %20 = vector.load %arg5[%c0_9, %c0_10, %c0_11] : memref<1x128x128xbf16, #tpu.memory_space<vmem>>, vector<1x128x128xbf16>
    %21 = vector.shape_cast %20 : vector<1x128x128xbf16> to vector<128x128xbf16>
    %cst_12 = arith.constant dense<0.000000e+00> : vector<16x128xf32>
    %22 = tpu.matmul %19, %21, %cst_12 {dimension_numbers = #tpu.dot_dimension_numbers<[1], [0], [0], [1], [0, 0, 1, 1], [], []>} : vector<16x128xbf16>, vector<128x128xbf16>, vector<16x128xf32> -> vector<16x128xf32>
    %c0_13 = arith.constant 0 : index
    %c0_14 = arith.constant 0 : index
    %c0_15 = arith.constant 0 : index
    %23 = vector.load %arg6[%c0_13, %c0_14, %c0_15] : memref<1x1x128xf32, #tpu.memory_space<vmem>>, vector<1x1x128xf32>
    %24 = vector.shape_cast %23 : vector<1x1x128xf32> to vector<1x128xf32>
    %25 = vector.broadcast %24 : vector<1x128xf32> to vector<16x128xf32>
    %26 = arith.addf %22, %25 : vector<16x128xf32>
    %cst_16 = arith.constant 1.000000e+00 : f32
    %27 = arith.subf %cst_16, %8 : f32
    %28 = vector.broadcast %27 : f32 to vector<16x128xf32>
    %29 = arith.mulf %28, %18 : vector<16x128xf32>
    %30 = vector.broadcast %8 : f32 to vector<16x128xf32>
    %31 = arith.mulf %30, %15 : vector<16x128xf32>
    %32 = arith.addf %29, %31 : vector<16x128xf32>
    %cst_17 = arith.constant 1.000000e+00 : f32
    %33 = arith.subf %cst_17, %6 : f32
    %34 = vector.broadcast %33 : f32 to vector<16x128xf32>
    %35 = arith.mulf %34, %26 : vector<16x128xf32>
    %36 = vector.broadcast %6 : f32 to vector<16x128xf32>
    %37 = arith.mulf %36, %14 : vector<16x128xf32>
    %38 = arith.addf %35, %37 : vector<16x128xf32>
    %39 = arith.addf %32, %38 : vector<16x128xf32>
    %cst_18 = arith.constant 0.000000e+00 : f32
    %40 = vector.broadcast %cst_18 : f32 to vector<16x128xf32>
    %41 = arith.maximumf %39, %40 : vector<16x128xf32>
    %c3_i32 = arith.constant 3 : i32
    %42 = arith.cmpi slt, %arg0, %c3_i32 : i32
    %43 = arith.extui %42 : i1 to i32
    %c0_i32_19 = arith.constant 0 : i32
    %44 = arith.cmpi ne, %43, %c0_i32_19 : i32
    scf.if %44 {
      %48 = arith.index_cast %4 : i32 to index
      %c0_22 = arith.constant 0 : index
      %c0_23 = arith.constant 0 : index
      %49 = vector.load %arg8[%48, %c0_22, %c0_23] : memref<2x16x128xf32, #tpu.memory_space<vmem>>, vector<1x16x128xf32>
      %50 = vector.shape_cast %49 : vector<1x16x128xf32> to vector<16x128xf32>
      %51 = vector.shape_cast %41 : vector<16x128xf32> to vector<1x16x128xf32>
      tpu.vector_store %arg8[%48, %c0_22, %c0_23], %51 {strides = array<i32>} : memref<2x16x128xf32, #tpu.memory_space<vmem>>, vector<1x16x128xf32>,
    } else {
    }
    %c3_i32_20 = arith.constant 3 : i32
    %45 = arith.cmpi eq, %arg0, %c3_i32_20 : i32
    %46 = arith.extui %45 : i1 to i32
    %c0_i32_21 = arith.constant 0 : i32
    %47 = arith.cmpi ne, %46, %c0_i32_21 : i32
    scf.if %47 {
      %c0_22 = arith.constant 0 : index
      %c0_23 = arith.constant 0 : index
      %48 = vector.load %arg7[%c0_22, %c0_23] : memref<16x128xf32, #tpu.memory_space<vmem>>, vector<16x128xf32>
      tpu.vector_store %arg7[%c0_22, %c0_23], %41 {strides = array<i32>} : memref<16x128xf32, #tpu.memory_space<vmem>>, vector<16x128xf32>,
    } else {
    }
    return
  }
  func.func @transform_0(%arg0: i32, %arg1: memref<4xf32, #tpu.memory_space<smem>>, %arg2: memref<4xf32, #tpu.memory_space<smem>>) -> (i32, i32) {
    %c0_i32 = arith.constant 0 : i32
    %c0_i32_0 = arith.constant 0 : i32
    %c0_i32_1 = arith.constant 0 : i32
    return %c0_i32, %c0_i32_0 : i32, i32
  }
  func.func @transform_1(%arg0: i32, %arg1: memref<4xf32, #tpu.memory_space<smem>>, %arg2: memref<4xf32, #tpu.memory_space<smem>>) -> (i32, i32) {
    %c0_i32 = arith.constant 0 : i32
    %c0_i32_0 = arith.constant 0 : i32
    %c0_i32_1 = arith.constant 0 : i32
    return %c0_i32, %c0_i32_0 : i32, i32
  }
  func.func @transform_2(%arg0: i32, %arg1: memref<4xf32, #tpu.memory_space<smem>>, %arg2: memref<4xf32, #tpu.memory_space<smem>>) -> (i32, i32, i32) {
    %c0_i32 = arith.constant 0 : i32
    %c0_i32_0 = arith.constant 0 : i32
    %c0_i32_1 = arith.constant 0 : i32
    return %arg0, %c0_i32, %c0_i32_0 : i32, i32, i32
  }
  func.func @transform_3(%arg0: i32, %arg1: memref<4xf32, #tpu.memory_space<smem>>, %arg2: memref<4xf32, #tpu.memory_space<smem>>) -> (i32, i32, i32) {
    %c0_i32 = arith.constant 0 : i32
    %c0_i32_0 = arith.constant 0 : i32
    %c0_i32_1 = arith.constant 0 : i32
    return %arg0, %c0_i32, %c0_i32_0 : i32, i32, i32
  }
  func.func @transform_4(%arg0: i32, %arg1: memref<4xf32, #tpu.memory_space<smem>>, %arg2: memref<4xf32, #tpu.memory_space<smem>>) -> (i32, i32) {
    %c0_i32 = arith.constant 0 : i32
    %c0_i32_0 = arith.constant 0 : i32
    %c0_i32_1 = arith.constant 0 : i32
    return %c0_i32, %c0_i32_0 : i32, i32
  }
}

</mosaic_0001>

<bundles_post_ra>
// kernel: tpu_custom_call.1
= control target key start
LH: loop header
LB: loop body
LE: loop exit
PB: predicated region body
PF: predicated region fallthrough
CT: control target
= control target key end

     0   :  { %s1223_s0 = inlined_call_operand.hbm [shape: f32[4], index: 0, kind: input, shape index: {}]   ;;  %s1224_s2 = inlined_call_operand.hbm [shape: bf16[16,16], index: 2, kind: input, shape index: {}]   ;;  %s1225_s3 = inlined_call_operand.hbm [shape: f32[16,128], index: 3, kind: input, shape index: {}]   ;;  %s1226_s4 = inlined_call_operand.hbm [shape: bf16[4,128,128], index: 4, kind: input, shape index: {}]   ;;  %s1227_s5 = inlined_call_operand.vmem [shape: f32[4,1,128], index: 5, kind: input, shape index: {}]   ;;  %s1228_s6 = inlined_call_operand.hbm [shape: f32[16,128], index: 6, kind: output, shape index: {}]   ;;  %s1229_s1 = inlined_call_operand.vmem [shape: f32[4], index: 1, kind: input, shape index: {}]  }
   0x1   :  { %s729_s23 = scalar_lea.hbm %s1223_s0, 16 }
   0x2   :  { %p730_p0 = scmp.ne.s32.totalorder %s1223_s0, %s729_s23  ;;  %p733_p1 = scmp.lt.u32.totalorder %s729_s23, %s1223_s0 }
   0x4   :  { %p735_p2 = pnand %p733_p1, %p730_p0 }
   0x6   :  { %738 = shalt.err (!%p735_p2)  }
   0x7   :  { %s913_s28 = smov [#allocation4]   ;;  %s13_s9 = sshll.u32 %s1229_s1, 4  ;;  %s14_s9 = int_to_ptr.vmem [resolvable:$true] %s13_s9 }
   0x8   :  { %12 = dma.hbm_to_smem %s1223_s0, 16, %s913_s28, [#allocation3] }
   0x9   :  { %s739_s10 = scalar_lea.vmem %s14_s9, 16  ;;  %p744_p4 = scmp.lt.s32.totalorder %s14_s9, %s14_s9 }
   0xa   :  { %p740_p3 = scmp.ne.s32.totalorder %s14_s9, %s739_s10  ;;  %p745_p5 = scmp.lt.s32.totalorder %s739_s10, %s739_s10 }
   0xc   :  { %p746_p6 = por %p745_p5, %p744_p4 }
   0xe   :  { %p747_p7 = pnand %p746_p6, %p740_p3 }
  0x10   :  { %750 = shalt.err (!%p747_p7)  }
  0x11   :  { %s914_s11 = smov [#allocation5]  }
  0x12   :  { %16 = dma.vmem_to_smem %s14_s9, 16, %s914_s11, [#allocation3] }
  0x13   :  { %879 = dma.done.wait [#allocation3], 32 }
  0x14   :  { %880 = vsyncadd [#allocation3], 4294967264 }
  0x15   :  { %18 = sfence }
  0x16   :  { %19 = vsyncpa [#allocation7], 0 }
  0x17   :  { %20 = vsyncpa [#allocation10], 0 }
  0x18   :  { %21 = vsyncpa [#allocation8], 0  ;;  %s978_s0 = smov 0   ;;  %s980_s12 = smov 0  }
  0x19   :  { %s982_s1 = smov 0   ;;  %s984_s13 = smov 0  }
  0x1a LB: > { %s997_s14 = sadd.s32 4294967295, %s911_s13   ;;  %s1000_s15 = sadd.s32 1, %s911_s13   ;;  %s911_s13 = sphi %s984_s13, %s1250_s13   ;;  %s907_s1 = sphi %s982_s1, %s1249_s1   ;;  %s903_s12 = sphi %s980_s12, %s1248_s12   ;;  %s899_s0 = sphi %s978_s0, %s1247_s0  }
  0x1b   : > { %s73_s16 = ssub.s32 %s911_s13, %s1000_s15  ;;  %s76_s17 = sadd.s32 1, %s907_s1 }
  0x1c   : > { %p74_p8 = scmp.eq.s32.totalorder %s73_s16, 0  ;;  %p83_p9 = scmp.ne.s32.totalorder %s907_s1, %s903_s12 }
  0x1d   : > { %p84_p10 = scmp.eq.s32.totalorder %s911_s13, 0  ;;  %p89_p11 = scmp.ne.s32.totalorder %s903_s12, %s899_s0 }
  0x1e   : > { %s1010_s18 = scalar_select %p74_p8, %s907_s1, %s76_s17  }
  0x1f   : > { %p1012_p12 = por %p84_p10, %p83_p9  ;;  %p1230_p13 = scmp.eq.s32.totalorder %s997_s14, 0 }
  0x20   : > { %p573_p0 = scmp.ge.s32.totalorder %s911_s13, 1  ;;  %p147_p1 = scmp.lt.s32.totalorder %s911_s13, 5 }
  0x21   : > { %p1021_p2 = por %p1230_p13, %p89_p11  ;;  %s915_s22 = smov [#allocation6]  }
  0x22   : > { %p1026_p4 = pnand %p573_p0, %p147_p1  ;;  %s159_s23 = sshll.u32 %s915_s22, 4  ;;  %s160_s23 = int_to_ptr.vmem [resolvable:$true] %s159_s23 }
  0x23   : > { %s1235_s20 = scalar_select %p1021_p2, 1, 0 }
  0x24   : > { %s1236_s21 = scalar_select %p1026_p4, 1, 0 }
  0x25   : > { %p656_p5 = pneg %p1026_p4  ;;  %p669_p7 = scmp.lt.s32.totalorder %s911_s13, 4 }
  0x26   : > { %s751_s28 = scalar_lea.hbm %s1224_s2, 128 }
  0x27   : > { %p1034_p6 = pnand %p656_p5, %p1230_p13  ;;  %p1041_p8 = pnand %p669_p7, %p1012_p12 }
  0x28   : > { %p752_p9 = scmp.ne.s32.totalorder %s1224_s2, %s751_s28  ;;  %p758_p12 = scmp.lt.u32.totalorder %s751_s28, %s1224_s2 }
  0x29   : > { %s1238_s25 = scalar_select %p1041_p8, 1, 0 }
  0x2a   : > { %p753_p10 = pneg %p1034_p6 }
  0x2c   : > { %p754_p11 = pnand %p753_p10, %p752_p9 }
  0x2e   : > { %p755_p0 = pneg %p754_p11 }
  0x30   : > { %p760_p1 = pnand %p758_p12, %p755_p0 }
  0x32   : > { %763 = shalt.err (!%p760_p1)
}
  0x33   : > { %s764_s9 = scalar_lea.vmem %s160_s23, 128  ;;  %p772_p13 = scmp.lt.s32.totalorder %s160_s23, %s160_s23 }
  0x34   : > { %p765_p5 = scmp.ne.s32.totalorder %s160_s23, %s764_s9  ;;  %p773_p2 = scmp.lt.s32.totalorder %s764_s9, %s764_s9 }
  0x36   : > { %p767_p7 = pnand %p765_p5, %p753_p10  ;;  %p774_p4 = por %p773_p2, %p772_p13 }
  0x38   : > { %p768_p3 = pneg %p767_p7 }
  0x3a   : > { %p775_p8 = pnand %p774_p4, %p768_p3 }
  0x3c   : > { %778 = shalt.err (!%p775_p8)
}
  0x3d   : > { %s916_s10 = smov 64   ;;  %s917_s11 = smov 4  }
  0x3e   : > { %659 = dma.hbm_to_vmem [thread:$0]  (!%p1034_p6), %s1224_s2, 128, %s160_s23, [#allocation7], %s916_s10, %s916_s10, %s917_s11  }
  0x3f   : > { %s918_s17 = smov [#allocation9]   ;;  %s779_s27 = scalar_lea.hbm %s1225_s3, 256 }
  0x40   : > { %s172_s19 = sshll.u32 %s918_s17, 4  ;;  %p780_p13 = scmp.ne.s32.totalorder %s1225_s3, %s779_s27  ;;  %s173_s19 = int_to_ptr.vmem [resolvable:$true] %s172_s19 }
  0x41   : > { %p786_p4 = scmp.lt.u32.totalorder %s779_s27, %s1225_s3 }
  0x42   : > { %p782_p2 = pnand %p780_p13, %p753_p10 }
  0x44   : > { %p783_p3 = pneg %p782_p2 }
  0x46   : > { %p788_p8 = pnand %p786_p4, %p783_p3 }
  0x48   : > { %791 = shalt.err (!%p788_p8)
}
  0x49   : > { %s792_s23 = scalar_lea.vmem %s173_s19, 256  ;;  %p800_p12 = scmp.lt.s32.totalorder %s173_s19, %s173_s19 }
  0x4a   : > { %p793_p9 = scmp.ne.s32.totalorder %s173_s19, %s792_s23  ;;  %p801_p1 = scmp.lt.s32.totalorder %s792_s23, %s792_s23 }
  0x4c   : > { %p795_p11 = pnand %p793_p9, %p753_p10  ;;  %p802_p5 = por %p801_p1, %p800_p12 }
  0x4e   : > { %p796_p0 = pneg %p795_p11 }
  0x50   : > { %p803_p7 = pnand %p802_p5, %p796_p0 }
  0x52   : > { %806 = shalt.err (!%p803_p7)
}
  0x53   : > { %s919_s8 = smov 128   ;;  %s920_s9 = smov 8  }
  0x54   : > { %662 = dma.hbm_to_vmem [thread:$0]  (!%p1034_p6), %s1225_s3, 256, %s173_s19, [#allocation10], %s919_s8, %s919_s8, %s920_s9  }
  0x55   : > { %s186_s17 = sand.u32 1, %s911_s13   ;;  %s188_s22 = sand.u32 1, %s907_s1  }
  0x56   : > { %s577_s26 = sshll.u32 %s188_s22, 6  ;;  %s604_s27 = sshll.u32 %s911_s13, 10 }
  0x57   : > { %s1096_s30 = scalar_lea.hbm %s1226_s4, %s604_s27  ;;  %s190_s7 = scalar_lea.vmem [#allocation11], %s577_s26 }
  0x58   : > { %s197_s23 = sshll.u32 %s190_s7, 4  ;;  %s1100_s24 = scalar_lea.sflag [#allocation7], %s186_s17  ;;  %s1098_s23 = int_to_ptr.vmem [resolvable:$true] %s197_s23 }
  0x59   : > { %s807_s19 = scalar_lea.hbm %s1096_s30, 1024  ;;  %p1239_p10 = scmp.ne.s32.totalorder %s1238_s25, 0 }
  0x5a   : > { %p808_p6 = scmp.ne.s32.totalorder %s1096_s30, %s807_s19  ;;  %s812_s9 = scalar_lea.hbm %s1226_s4, 4096 }
  0x5b   : > { %p809_p13 = pneg %p1239_p10  ;;  %p813_p4 = scmp.lt.u32.totalorder %s1096_s30, %s1226_s4 }
  0x5c   : > { %p814_p8 = scmp.lt.u32.totalorder %s812_s9, %s807_s19  ;;  %p816_p11 = scmp.lt.u32.totalorder %s807_s19, %s1096_s30 }
  0x5d   : > { %p810_p2 = pnand %p809_p13, %p808_p6 }
  0x5e   : > { %p815_p9 = por %p814_p8, %p813_p4 }
  0x5f   : > { %p811_p3 = pneg %p810_p2 }
  0x60   : > { %p817_p0 = por %p816_p11, %p815_p9 }
  0x62   : > { %p818_p12 = pnand %p817_p0, %p811_p3 }
  0x64   : > { %821 = shalt.err (!%p818_p12)
}
  0x65   : > { %s822_s17 = scalar_lea.vmem %s1098_s23, 1024  ;;  %s921_s22 = smov [#allocation11]  }
  0x66   : > { %p823_p1 = scmp.ne.s32.totalorder %s1098_s23, %s822_s17  ;;  %s827_s26 = sshll.u32 %s921_s22, 4  ;;  %s828_s26 = int_to_ptr.vmem [resolvable:$false] %s827_s26 }
  0x67   : > { %s829_s27 = scalar_lea.vmem %s828_s26, 2048  ;;  %p830_p6 = scmp.lt.s32.totalorder %s1098_s23, %s828_s26 }
  0x68   : > { %p825_p5 = pnand %p823_p1, %p809_p13  ;;  %p831_p2 = scmp.lt.s32.totalorder %s829_s27, %s822_s17 }
  0x6a   : > { %p826_p7 = pneg %p825_p5  ;;  %p832_p4 = por %p831_p2, %p830_p6 }
  0x6c   : > { %p833_p8 = pnand %p832_p4, %p826_p7 }
  0x6e   : > { %836 = shalt.err (!%p833_p8)
}
  0x6f   : > { %666 = dma.hbm_to_vmem [thread:$0]  (!%p1239_p10), %s1096_s30, 1024, %s1098_s23, %s1100_s24, %s916_s10, %s916_s10, %s917_s11  }
  0x70   : > { %p1240_p13 = scmp.ne.s32.totalorder %s1236_s21, 0 }
  0x71   : > { %p1241_p3 = scmp.eq.s32.totalorder (!%p1240_p13), %s997_s14, 0 }
  0x72   : > { %215 = sbr.rel (%p1240_p13) target bundleno = 624 (0x270), region = 36 }
  0x79   : > { %882 = dma.done.wait (%p1241_p3), [#allocation7], 128   ;;  %p1242_p9 = pmov %p1241_p3 }
  0x7a   : > { %p1243_p11 = pmov %p1241_p3 }
  0x7b   : > { %884 = vsyncadd (%p1242_p9), [#allocation7], 4294967168 }
  0x7c   : > { %886 = dma.done.wait (%p1243_p11), [#allocation10], 256   ;;  %p1244_p0 = pmov %p1241_p3 }
  0x7d   : > { %s1142_s25 = sand.u32 1, %s997_s14   ;;  %s227_s21 = sand.u32 1, %s903_s12  }
  0x7e   : > { %888 = vsyncadd (%p1244_p0), [#allocation10], 4294967040  ;;  %s583_s10 = sshll.u32 %s227_s21, 6  ;;  %s226_s11 = scalar_lea.sflag [#allocation7], %s1142_s25 }
  0x7f   : > { %s1146_s28 = scalar_lea.vmem [#allocation11], %s583_s10  ;;  %p1245_p10 = scmp.ne.s32.totalorder %s1235_s20, 0 }
  0x81   : > { %890 = dma.done.wait (%p1245_p10), %s226_s11, 1024  }
  0x82   : > { %892 = vsyncadd (%p1245_p10), %s226_s11, 4294966272  ;;  %p252_p12 = scmp.lt.s32.totalorder %s997_s14, 3  ;;  %p1246_p1 = scmp.ne.s32.totalorder %s997_s14, 0 }
  0x83   : > { %v260_v0 = vld [vmem:[#allocation9] sm:$0xff] (!%p1246_p1)  ;;  %v261_v1 = vld [vmem:[#allocation9 + $0x8] sm:$0xff] (!%p1246_p1)  ;;  %v922_v2 = vmov (!%p1246_p1), 0.0  }
  0x84   : > { %s1154_s29 = scalar_select %p252_p12, %s997_s14, 3 }
  0x85   : > { %259 = sbr.rel (%p1246_p1) target bundleno = 140 (0x8c), region = 52  ;;  %262 = vst [vmem:[#allocation2] sm:$0xff] (!%p1246_p1), %v260_v0  ;;  %263 = vst [vmem:[#allocation2 + $0x8] sm:$0xff] (!%p1246_p1), %v261_v1 }
  0x86   : > { %s254_s23 = scalar_lea.vmem %s1227_s5, %s1154_s29  ;;  %265 = vst [vmem:[#allocation2 + $0x10] sm:$0xff] (!%p1246_p1), %v922_v2  ;;  %266 = vst [vmem:[#allocation2 + $0x18] sm:$0xff] (!%p1246_p1), %v922_v2 }
  0x8c PF: > { %s585_s20 = sshll.u32 %s1142_s25, 4  ;;  %v923_v3 = vmov 0.0   ;;  %vm924_vm0 = vmmov 0   ;;  %v721_v7 = vld [vmem:[%s1146_s28] sm:$0xff]   ;;  %v720_v8 = vld [vmem:[#allocation6] sm:$0xff]   ;;  %vm289_vm1 = vcmask 130048  }
  0x8d   : > { %616 = vmatprep.subr.bf16.mxu0 %v923_v3  ;;  %618 = vmatprep.mubr.msk.bf16.mxu0 %vm924_vm0, %v923_v3  ;;  %s272_s24 = scalar_lea.vmem [#allocation2], %s585_s20  ;;  %v722_v9 = vld [vmem:[%s1146_s28 + $0x8] sm:$0xff]   ;;  %v723_v10 = vld [vmem:[%s1146_s28 + $0x10] sm:$0xff]   ;;  %v724_v11 = vld [vmem:[%s1146_s28 + $0x18] sm:$0xff]   ;;  %s270_s19 = sld [smem:[#allocation5 + %s997_s14]] }
  0x8e   : > { %v273_v4 = vld [vmem:[%s272_s24] sm:$0xff]  ;;  %v274_v5 = vld [vmem:[%s272_s24 + $0x8] sm:$0xff]  ;;  %622 = vmatprep.subr.bf16.mxu1 %v923_v3  ;;  %638 = vmatprep.mubr.msk.bf16.mxu1 %vm924_vm0, %v923_v3  ;;  %s269_s13 = sld [smem:[#allocation4 + %s997_s14]]  ;;  %s268_s8 = ssub.s32 1, %s1142_s25 }
  0x8f   : > { %v283_v6 = vpack.c.bf16 %v274_v5, %v273_v4  ;;  %623 = vmatpush3.bf16.msra.mxu1 %v721_v7  ;;  %v725_v12 = vld [vmem:[%s1146_s28 + $0x20] sm:$0xff]   ;;  %v726_v13 = vld [vmem:[%s1146_s28 + $0x28] sm:$0xff]   ;;  %v727_v14 = vld [vmem:[%s1146_s28 + $0x30] sm:$0xff]   ;;  %s586_s9 = sshll.u32 %s268_s8, 4  ;;  %p598_p5 = scmp.ge.s32.totalorder %s997_s14, 3 }
  0x90   : > { %624 = vmatprep.subr.bf16.mxu1 %v923_v3  ;;  %v728_v15 = vld [vmem:[%s1146_s28 + $0x38] sm:$0xff]   ;;  %v279_v22 = vld [vmem:[#allocation9] sm:$0xff]  ;;  %s1174_s17 = scalar_lea.vmem [#allocation2], %s586_s9  ;;  %v589_v25 = vld [vmem:[%s254_s23] ss:$0 sm:$0xff] }
  0x91   : > { %617 = vmatpush3.bf16.msra.mxu0 %v283_v6  ;;  %v277_v24 = vld [vmem:[%s1174_s17] sm:$0xff]  ;;  %v280_v27 = vld [vmem:[#allocation9 + $0x8] sm:$0xff]  ;;  %v278_v30 = vld [vmem:[%s1174_s17 + $0x8] sm:$0xff] }
  0x93   : > { %625 = vmatpush3.bf16.msra.mxu1 %v722_v9  ;;  %s447_s0 = ssub.f32 1.0, %s270_s19  ;;  %v451_v23 = vstv %s270_s19 }
  0x94   : > { %619 = vmatmul.mubr.msk.bf16.vlgmr.msra.gmra.mrb[0].mxu0 %vm289_vm1, %v720_v8  ;;  %626 = vmatprep.subr.bf16.mxu1 %v923_v3  ;;  %s456_s16 = ssub.f32 1.0, %s269_s13  ;;  %v460_v26 = vstv %s269_s13  ;;  %v452_v32 = vmul.f32 %v451_v23, %v279_v22  ;;  %v453_v36 = vmul.f32 %v451_v23, %v280_v27 }
  0x95   : > { %v448_v21 = vstv %s447_s0  ;;  %v461_v34 = vmul.f32 %v460_v26, %v277_v24  ;;  %v462_v41 = vmul.f32 %v460_v26, %v278_v30 }
  0x96   : > { %v457_v29 = vstv %s456_s16 }
  0x97   : > { %627 = vmatpush3.bf16.msra.mxu1 %v723_v10 }
  0x98   : > { %628 = vmatprep.subr.bf16.mxu1 %v923_v3 }
  0x9b   : > { %629 = vmatpush3.bf16.msra.mxu1 %v724_v11 }
  0x9c   : > { %630 = vmatprep.subr.bf16.mxu1 %v923_v3 }
  0x9f   : > { %631 = vmatpush3.bf16.msra.mxu1 %v725_v12 }
  0xa0   : > { %632 = vmatprep.subr.bf16.mxu1 %v923_v3 }
  0xa3   : > { %633 = vmatpush3.bf16.msra.mxu1 %v726_v13 }
  0xa4   : > { %634 = vmatprep.subr.bf16.mxu1 %v923_v3 }
  0xa7   : > { %635 = vmatpush3.bf16.msra.mxu1 %v727_v14 }
  0xa8   : > { %636 = vmatprep.subr.bf16.mxu1 %v923_v3 }
  0xab   : > { %637 = vmatpush3.bf16.msra.mxu1 %v728_v15 }
 0x167   : > { %v327_v16 = vpop.f32.mrb[0].mxu0 }
 0x168   : > { %v620_v17 = vpop.f32.mrb[1].mxu0  ;;  %v449_v31 = vmul.f32 %v448_v21, %v327_v16 }
 0x169   : > { %v330_v18 = vpop.f32.mrb[2].mxu0 }
 0x16a   : > { %v334_v19 = vpack.c.bf16 %v330_v18, %v327_v16  ;;  %v621_v20 = vpop.f32.mrb[3].mxu0  ;;  %v450_v38 = vmul.f32 %v448_v21, %v330_v18  ;;  %v454_v43 = vadd.f32 %v452_v32, %v449_v31 }
 0x16c   : > { %639 = vmatmul.mubr.bf16.vlgmr.msra.gmra.mrb[0].mxu1 %v334_v19  ;;  %v455_v46 = vadd.f32 %v453_v36, %v450_v38 }
 0x23f   : > { %v440_v28 = vpop.f32.mrb[0].mxu1 }
 0x240   : > { %v441_v33 = vadd.f32 %v589_v25, %v440_v28  ;;  %v640_v35 = vpop.f32.mrb[1].mxu1 }
 0x241   : > { %v443_v37 = vpop.f32.mrb[2].mxu1 }
 0x242   : > { %v458_v39 = vmul.f32 %v457_v29, %v441_v33  ;;  %v444_v40 = vadd.f32 %v589_v25, %v443_v37  ;;  %v641_v42 = vpop.f32.mrb[3].mxu1 }
 0x244   : > { %v463_v44 = vadd.f32 %v461_v34, %v458_v39  ;;  %v459_v45 = vmul.f32 %v457_v29, %v444_v40  ;;  %472 = sbr.rel (%p598_p5) target bundleno = 589 (0x24d), region = 56 }
 0x246   : > { %v465_v47 = vadd.f32 %v463_v44, %v454_v43  ;;  %v464_v48 = vadd.f32 %v462_v41, %v459_v45 }
 0x248   : > { %v467_v49 = vmax.f32 %v465_v47, 0.0  ;;  %v466_v50 = vadd.f32 %v464_v48, %v455_v46 }
 0x24a   : > { %v468_v51 = vmax.f32 %v466_v50, 0.0  ;;  %473 = vst [vmem:[%s1174_s17] sm:$0xff] (!%p598_p5), %v467_v49 }
 0x24c   : > { %474 = vst [vmem:[%s1174_s17 + $0x8] sm:$0xff] %v468_v51 }
 0x24d PF: > { %p599_p7 = scmp.ne.s32.totalorder %s997_s14, 3 }
 0x24e   : > { %479 = vst [vmem:[#allocation12] sm:$0xff] (!%p599_p7), %v467_v49  ;;  %480 = vst [vmem:[#allocation12 + $0x8] sm:$0xff] (!%p599_p7), %v468_v51 }
 0x24f   : > { %478 = sbr.rel (%p599_p7) target bundleno = 598 (0x256), region = 60 }
 0x256 PF: > { %p672_p6 = scmp.eq.s32.totalorder %s997_s14, 3  ;;  %s925_s27 = smov [#allocation12]  }
 0x257   : > { %s487_s25 = sshll.u32 %s925_s27, 4  ;;  %s488_s25 = int_to_ptr.vmem [resolvable:$true] %s487_s25 }
 0x258   : > { %s837_s21 = scalar_lea.vmem %s488_s25, 256  ;;  %p844_p13 = scmp.lt.s32.totalorder %s488_s25, %s488_s25 }
 0x259   : > { %p838_p2 = scmp.ne.s32.totalorder %s488_s25, %s837_s21  ;;  %p845_p3 = scmp.lt.s32.totalorder %s837_s21, %s837_s21 }
 0x25b   : > { %p839_p4 = pnand %p838_p2, %p672_p6  ;;  %p846_p9 = por %p845_p3, %p844_p13 }
 0x25d   : > { %p840_p8 = pneg %p839_p4 }
 0x25f   : > { %p847_p11 = pnand %p846_p9, %p840_p8 }
 0x261   : > { %850 = shalt.err (!%p847_p11)
}
 0x262   : > { %s851_s28 = scalar_lea.hbm %s1228_s6, 256 }
 0x263   : > { %p852_p0 = scmp.ne.s32.totalorder %s1228_s6, %s851_s28  ;;  %p857_p1 = scmp.lt.u32.totalorder %s851_s28, %s1228_s6 }
 0x265   : > { %p853_p10 = pnand %p852_p0, %p672_p6 }
 0x267   : > { %p854_p12 = pneg %p853_p10 }
 0x269   : > { %p859_p5 = pnand %p857_p1, %p854_p12 }
 0x26b   : > { %862 = shalt.err (!%p859_p5)
}
 0x26c   : > { %s926_s20 = smov 128   ;;  %s927_s24 = smov 8  }
 0x26d   : > { %653 = dma.vmem_to_hbm [thread:$0]  (%p672_p6), %s488_s25, 256, %s1228_s6, [#allocation8], %s926_s20, %s926_s20, %s927_s24  }
 0x26e   : > { %894 = dma.done.wait (%p672_p6), [#allocation8], 256  }
 0x26f   : > { %896 = vsyncadd (%p672_p6), [#allocation8], 4294967040 }
 0x270 PF: > { %p24_p7 = scmp.ge.s32.totalorder %s1000_s15, 6   ;;  %s1247_s0 = smov %s903_s12 }
 0x271   : > { %s1248_s12 = smov %s907_s1  ;;  %s1249_s1 = smov %s1010_s18 }
 0x272   : > { %s1250_s13 = smov %s1000_s15  ;;  %26 = sbr.rel (!%p24_p7) target bundleno = 26 (0x1a), region = 98 }
 0x279   :  { %503 = vsyncpa [#allocation7], 1 }
 0x27a   :  { %505 = vsyncpa [#allocation7 + $0x1], 1 }
 0x27b   :  { %506 = vsyncpa [#allocation10], 1 }
 0x27c   :  { %507 = vsyncpa [#allocation8], 1 }
 0x27d   :  { %509 = vsyncpa [#allocation8 + $0x1], 1 }

</bundles_post_ra>
